<compile_context>
chip_gen: v7x
topology: tpu7x:2x2x1
jax: 0.10.0
libtpu: 0.0.40
codegen_flags: <defaults>
</compile_context>

<pallas_src>
import functools

import jax
import jax.numpy as jnp
from jax.experimental import pallas as pl
from jax.experimental.pallas import tpu as pltpu

_LANES = 128
_SUBLANES = 8
# (2048, 128) f32 tile = 1 MiB per buffer; amortizes the ~0.35 us per-grid-step
# overhead while staying far below every generation's scoped-VMEM default.
_MAX_BLOCK_ROWS = 2048


def _partial_sum_kernel(nrows_ref, x_ref, o_ref, *, needs_mask: bool):
    block_rows = x_ref.shape[0]

    # Load the tile in its native dtype; accumulate in f32 (pure VPU work).
    x = x_ref[...].astype(jnp.float32)

    if needs_mask:
        # Only the last block can be partial; zero rows beyond the valid count.
        row_start = pl.program_id(0) * block_rows
        row_ids = jax.lax.broadcasted_iota(jnp.int32, x.shape, 0) + row_start
        x = jnp.where(row_ids < nrows_ref[0], x, 0.0)

    # Elementwise (8, 128) vector partial sum: vreg-vreg adds only, no XLU,
    # no serialized scalar read-modify-write per step.
    o_ref[...] = jnp.sum(
        x.reshape(block_rows // _SUBLANES, _SUBLANES, _LANES), axis=0
    )


def neg_sum(outputs: jax.Array) -> jax.Array:
    """Pallas equivalent of Loss.forward: returns -sum(outputs) as an f32 scalar."""
    flat = outputs.reshape(-1)
    n = flat.shape[0]

    # Rows (of 128 lanes) covered by the kernel, rounded down to a multiple of
    # 8 sublanes; the small remainder (< 1024 elements) is summed in plain JAX.
    tile_elems = _SUBLANES * _LANES
    rows = (n // tile_elems) * _SUBLANES
    n_main = rows * _LANES

    tail_sum = (
        jnp.sum(flat[n_main:], dtype=jnp.float32)
        if n_main < n
        else jnp.float32(0.0)
    )

    if rows == 0:
        # Input too small for even one (8, 128) tile: plain JAX fallback.
        return -tail_sum

    main = flat if n_main == n else flat[:n_main]
    x2d = main.reshape(rows, _LANES)

    block_rows = min(_MAX_BLOCK_ROWS, rows)
    num_blocks = pl.cdiv(rows, block_rows)
    needs_mask = (rows % block_rows) != 0

    kernel = functools.partial(_partial_sum_kernel, needs_mask=needs_mask)

    partials = pl.pallas_call(
        kernel,
        out_shape=jax.ShapeDtypeStruct((num_blocks * _SUBLANES, _LANES), jnp.float32),
        grid_spec=pltpu.PrefetchScalarGridSpec(
            num_scalar_prefetch=1,  # valid-row count lands in SMEM
            grid=(num_blocks,),
            in_specs=[
                pl.BlockSpec((block_rows, _LANES), lambda i, nrows: (i, 0)),
            ],
            out_specs=pl.BlockSpec((_SUBLANES, _LANES), lambda i, nrows: (i, 0)),
        ),
        compiler_params=pltpu.CompilerParams(
            # Independent per-block partials -> both TensorCores usable on v7x.
            dimension_semantics=("parallel",),
        ),
        cost_estimate=pl.CostEstimate(
            flops=n_main,
            transcendentals=0,
            bytes_accessed=n_main * flat.dtype.itemsize
            + num_blocks * _SUBLANES * _LANES * 4,
        ),
    )(jnp.array([rows], dtype=jnp.int32), x2d)

    # Tiny final combine + negation in plain JAX (a few KiB of partials).
    # TODO(synk): for integer inputs torch.sum accumulates in int64; this
    # implementation accumulates in float32.
    return -(jnp.sum(partials) + tail_sum)


if __name__ == "__main__":
    key = jax.random.PRNGKey(0)
    # Small NCHW-like "outputs" tensor consistent with a generic model output.
    x = jax.random.normal(key, (2, 4, 16, 16), dtype=jnp.float32)

    result = jax.block_until_ready(neg_sum(x))

    # Reference check against plain JAX.
    ref = -jnp.sum(x)
    assert jnp.allclose(result, ref, rtol=1e-5, atol=1e-4), (result, ref)

    print("KERNEL_OK")
</pallas_src>

<mosaic_0001>
module attributes {stable_mosaic.version = 11 : i64} {
  func.func @_partial_sum_kernel(%arg0: i32, %arg1: memref<1xi32, #tpu.memory_space<smem>>, %arg2: memref<16x128xf32, #tpu.memory_space<vmem>>, %arg3: memref<8x128xf32, #tpu.memory_space<vmem>>) attributes {dimension_semantics = [#tpu.dimension_semantics<parallel>], iteration_bounds = array<i64: 1>, scalar_prefetch = 1 : i64, scratch_operands = 0 : i64, tpu.core_type = #tpu.core_type<tc>, window_params = [{transform_indices = @transform_0, window_bounds = array<i64: 16, 128>}, {transform_indices = @transform_1, window_bounds = array<i64: 8, 128>}]} {
    %c0 = arith.constant 0 : index
    %c0_0 = arith.constant 0 : index
    %0 = vector.load %arg2[%c0, %c0_0] : memref<16x128xf32, #tpu.memory_space<vmem>>, vector<16x128xf32>
    %1 = vector.shape_cast %0 : vector<16x128xf32> to vector<2x8x128xf32>
    %cst = arith.constant dense<0.000000e+00> : vector<8x128xf32>
    %2 = vector.multi_reduction <add>, %1, %cst [0] : vector<2x8x128xf32> to vector<8x128xf32>
    %c0_1 = arith.constant 0 : index
    %c0_2 = arith.constant 0 : index
    %3 = vector.load %arg3[%c0_1, %c0_2] : memref<8x128xf32, #tpu.memory_space<vmem>>, vector<8x128xf32>
    tpu.vector_store %arg3[%c0_1, %c0_2], %2 {strides = array<i32>} : memref<8x128xf32, #tpu.memory_space<vmem>>, vector<8x128xf32>,
    return
  }
  func.func @transform_0(%arg0: i32, %arg1: memref<1xi32, #tpu.memory_space<smem>>) -> (i32, i32) {
    %c0_i32 = arith.constant 0 : i32
    %c0_i32_0 = arith.constant 0 : i32
    return %arg0, %c0_i32 : i32, i32
  }
  func.func @transform_1(%arg0: i32, %arg1: memref<1xi32, #tpu.memory_space<smem>>) -> (i32, i32) {
    %c0_i32 = arith.constant 0 : i32
    %c0_i32_0 = arith.constant 0 : i32
    return %arg0, %c0_i32 : i32, i32
  }
}

</mosaic_0001>

<bundles_post_ra>
// kernel: tpu_custom_call.1
= control target key start
LH: loop header
LB: loop body
LE: loop exit
PB: predicated region body
PF: predicated region fallthrough
CT: control target
= control target key end

     0   :  { %8 = vsyncpa [#allocation5], 0  ;;  %s139_s0 = inlined_call_operand.<no memory space> [shape: s32[1], index: 0, kind: input, shape index: {}]   ;;  %s140_s1 = inlined_call_operand.hbm [shape: f32[16,128], index: 1, kind: input, shape index: {}]   ;;  %s141_s2 = inlined_call_operand.hbm [shape: f32[8,128], index: 2, kind: output, shape index: {}]  }
   0x1   :  { %9 = vsyncpa [#allocation6], 0  ;;  %s96_s9 = smov [#allocation4]   ;;  %s48_s13 = scalar_lea.hbm %s140_s1, 256 }
   0x2   :  { %s15_s10 = sshll.u32 %s96_s9, 4  ;;  %p49_p0 = scmp.ne.s32.totalorder %s140_s1, %s48_s13  ;;  %s16_s10 = int_to_ptr.vmem [resolvable:$true] %s15_s10 }
   0x3   :  { %p52_p1 = scmp.lt.u32.totalorder %s48_s13, %s140_s1 }
   0x5   :  { %p54_p2 = pnand %p52_p1, %p49_p0 }
   0x7   :  { %57 = shalt.err (!%p54_p2)
}
   0x8   :  { %s58_s17 = scalar_lea.vmem %s16_s10, 256  ;;  %p63_p4 = scmp.lt.s32.totalorder %s16_s10, %s16_s10 }
   0x9   :  { %p59_p3 = scmp.ne.s32.totalorder %s16_s10, %s58_s17  ;;  %p64_p5 = scmp.lt.s32.totalorder %s58_s17, %s58_s17 }
   0xb   :  { %p65_p6 = por %p64_p5, %p63_p4 }
   0xd   :  { %p66_p7 = pnand %p65_p6, %p59_p3 }
   0xf   :  { %69 = shalt.err (!%p66_p7)
}
  0x10   :  { %s97_s18 = smov 128   ;;  %s98_s19 = smov 8  }
  0x11   :  { %21 = dma.hbm_to_vmem [thread:$0]  %s140_s1, 256, %s16_s10, [#allocation5], %s97_s18, %s97_s18, %s98_s19  }
  0x12   :  { %92 = dma.done.wait [#allocation5], 256  }
  0x13   :  { %93 = vsyncadd [#allocation5], 4294967040  ;;  %s99_s22 = smov [#allocation7]   ;;  %v25_v0 = vld [vmem:[#allocation4] sm:$0xff]  ;;  %v26_v1 = vld [vmem:[#allocation4 + $0x8] sm:$0xff] }
  0x14   :  { %s35_s23 = sshll.u32 %s99_s22, 4  ;;  %v27_v2 = vadd.f32 %v26_v1, %v25_v0  ;;  %s36_s23 = int_to_ptr.vmem [resolvable:$true] %s35_s23 }
  0x15   :  { %s70_s24 = scalar_lea.vmem %s36_s23, 128  ;;  %p75_p9 = scmp.lt.s32.totalorder %s36_s23, %s36_s23 }
  0x16   :  { %28 = vst [vmem:[#allocation7] sm:$0xff] %v27_v2  ;;  %p71_p8 = scmp.ne.s32.totalorder %s36_s23, %s70_s24  ;;  %p76_p10 = scmp.lt.s32.totalorder %s70_s24, %s70_s24 }
  0x18   :  { %p77_p11 = por %p76_p10, %p75_p9 }
  0x1a   :  { %p78_p12 = pnand %p77_p11, %p71_p8 }
  0x1c   :  { %81 = shalt.err (!%p78_p12)
}
  0x1d   :  { %s82_s1 = scalar_lea.hbm %s141_s2, 128 }
  0x1e   :  { %p83_p13 = scmp.ne.s32.totalorder %s141_s2, %s82_s1  ;;  %p86_p0 = scmp.lt.u32.totalorder %s82_s1, %s141_s2 }
  0x20   :  { %p88_p1 = pnand %p86_p0, %p83_p13 }
  0x22   :  { %91 = shalt.err (!%p88_p1)
}
  0x23   :  { %38 = dma.vmem_to_hbm [thread:$0]  %s36_s23, 128, %s141_s2, [#allocation6]  }
  0x24   :  { %94 = dma.done.wait [#allocation6], 128  }
  0x25   :  { %95 = vsyncadd [#allocation6], 4294967168 }
  0x26   :  { %42 = vsyncpa [#allocation5], 1 }
  0x27   :  { %43 = vsyncpa [#allocation6], 1 }

</bundles_post_ra>
